<compile_context>
chip_gen: v7x
topology: tpu7x:2x2x1
jax: 0.10.0
libtpu: 0.0.40
codegen_flags: <defaults>
</compile_context>

<pallas_src>
import functools
import math

import numpy as np
import jax
import jax.numpy as jnp
from jax.experimental import pallas as pl
from jax.experimental.pallas import tpu as pltpu


def _round_up(x, m):
    return (x + m - 1) // m * m


def _pick_tile(K, cands, cap):
    if K <= cap:
        return K
    for c in cands:
        if K % c == 0:
            return c
    return K


# ----------------------------------------------------------------------------
# Pallas kernel 1: tiled dense matmul + bias (+ optional ReLU).
# bf16 operands, f32 accumulation. Used for the edge-MLP layers (the FLOP hot
# path, up to 8192x8192 weights) and the final FC layer.
# ----------------------------------------------------------------------------
def _dense_kernel(x_ref, w_ref, b_ref, o_ref, acc_ref, *, nk, relu):
    @pl.when(pl.program_id(2) == 0)
    def _():
        acc_ref[...] = jnp.zeros_like(acc_ref)

    acc_ref[...] += jnp.dot(x_ref[...], w_ref[...],
                            preferred_element_type=jnp.float32)

    @pl.when(pl.program_id(2) == nk - 1)
    def _():
        y = acc_ref[...] + b_ref[...]
        if relu:
            y = jnp.maximum(y, 0.0)
        o_ref[...] = y.astype(o_ref.dtype)


def dense(x, w, b, relu=False, out_dtype=jnp.float32):
    M, K = x.shape
    N = w.shape[1]
    Npad = _round_up(N, 128)                      # lane-dense output (unmasked vst)

    tm = min(128, _round_up(M, 16))
    Mp = _round_up(M, tm)
    tk = _pick_tile(K, (2048, 1024, 512, 256, 128), cap=2048)
    nk = K // tk
    tn = _pick_tile(Npad, (512, 256, 128), cap=512)

    xb = x.astype(jnp.bfloat16)
    if Mp != M:
        xb = jnp.pad(xb, ((0, Mp - M), (0, 0)))
    wb = w.astype(jnp.bfloat16)
    if Npad != N:
        wb = jnp.pad(wb, ((0, 0), (0, Npad - N)))
    bb = b.astype(jnp.float32)
    if Npad != N:
        bb = jnp.pad(bb, (0, Npad - N))
    bb = bb.reshape(1, Npad)

    out = pl.pallas_call(
        functools.partial(_dense_kernel, nk=nk, relu=relu),
        out_shape=jax.ShapeDtypeStruct((Mp, Npad), out_dtype),
        grid=(Npad // tn, Mp // tm, nk),          # j outermost -> megacore on N
        in_specs=[
            pl.BlockSpec((tm, tk), lambda j, i, k: (i, k)),
            pl.BlockSpec((tk, tn), lambda j, i, k: (k, j)),
            pl.BlockSpec((1, tn), lambda j, i, k: (0, j)),
        ],
        out_specs=pl.BlockSpec((tm, tn), lambda j, i, k: (i, j)),
        scratch_shapes=[pltpu.VMEM((tm, tn), jnp.float32)],
        compiler_params=pltpu.CompilerParams(
            dimension_semantics=("parallel", "parallel", "arbitrary")),
    )(xb, wb, bb)
    if Mp != M or Npad != N:
        out = out[:M, :N]
    return out


# ----------------------------------------------------------------------------
# Pallas kernel 2: per-edge message contraction of NNConv:
#   msg[e, o] = sum_k x_src[e, k] * theta[e, k*outdim + o]
# theta kept 2-D (lane-contiguous column slices), tiled over edges, bf16 inputs,
# f32 accumulation.
# ----------------------------------------------------------------------------
def _edge_msg_kernel(xs_ref, th_ref, o_ref, *, indim, outdim):
    acc = (xs_ref[:, 0:1] * th_ref[:, 0:outdim]).astype(jnp.float32)
    for k in range(1, indim):
        acc = acc + (xs_ref[:, k:k + 1] *
                     th_ref[:, k * outdim:(k + 1) * outdim]).astype(jnp.float32)
    o_ref[...] = acc


def edge_messages(x_src, theta2d, outdim):
    E, indim = x_src.shape
    hid = theta2d.shape[1]            # == indim * outdim
    TE = min(256, _round_up(E, 16))   # 256 edges * 8192 bf16 cols ~= 4 MiB / buffer
    Ep = _round_up(E, TE)

    xs = x_src.astype(jnp.bfloat16)
    th = theta2d.astype(jnp.bfloat16)
    if Ep != E:
        xs = jnp.pad(xs, ((0, Ep - E), (0, 0)))
        th = jnp.pad(th, ((0, Ep - E), (0, 0)))

    out = pl.pallas_call(
        functools.partial(_edge_msg_kernel, indim=indim, outdim=outdim),
        out_shape=jax.ShapeDtypeStruct((Ep, outdim), jnp.float32),
        grid=(Ep // TE,),
        in_specs=[
            pl.BlockSpec((TE, indim), lambda e: (e, 0)),
            pl.BlockSpec((TE, hid), lambda e: (e, 0)),
        ],
        out_specs=pl.BlockSpec((TE, outdim), lambda e: (e, 0)),
        compiler_params=pltpu.CompilerParams(
            dimension_semantics=("parallel",)),
    )(xs, th)
    return out[:E]


# ----------------------------------------------------------------------------
# Pallas kernel 3: fused NNConv epilogue:
#   out = relu( (x @ root_w + aggr) * bn_scale + bn_shift ) * node_mask
# (eval-mode BatchNorm folded into scale/shift; bias folded into shift).
# ----------------------------------------------------------------------------
def _nnconv_out_kernel(x_ref, w_ref, ag_ref, sc_ref, sh_ref, m_ref,
                       o_ref, acc_ref, *, nk):
    @pl.when(pl.program_id(2) == 0)
    def _():
        acc_ref[...] = jnp.zeros_like(acc_ref)

    acc_ref[...] += jnp.dot(x_ref[...], w_ref[...],
                            preferred_element_type=jnp.float32)

    @pl.when(pl.program_id(2) == nk - 1)
    def _():
        y = (acc_ref[...] + ag_ref[...]) * sc_ref[...] + sh_ref[...]
        o_ref[...] = jnp.maximum(y, 0.0) * m_ref[...]


def nnconv_bn_relu(x, root_w, aggr, scale, shift, node_mask):
    M, K = x.shape
    N = root_w.shape[1]
    Npad = _round_up(N, 128)
    tm = min(128, _round_up(M, 16))
    Mp = _round_up(M, tm)
    tn = _pick_tile(Npad, (512, 256, 128), cap=512)
    tk, nk = K, 1                                  # indim <= 64: single K block

    xb = jnp.pad(x.astype(jnp.bfloat16), ((0, Mp - M), (0, 0)))
    wb = jnp.pad(root_w.astype(jnp.bfloat16), ((0, 0), (0, Npad - N)))
    ag = jnp.pad(aggr.astype(jnp.float32), ((0, Mp - M), (0, Npad - N)))
    sc = jnp.pad(scale.reshape(1, N).astype(jnp.float32), ((0, 0), (0, Npad - N)))
    sh = jnp.pad(shift.reshape(1, N).astype(jnp.float32), ((0, 0), (0, Npad - N)))
    mk = jnp.pad(node_mask.astype(jnp.float32).reshape(M, 1), ((0, Mp - M), (0, 0)))

    out = pl.pallas_call(
        functools.partial(_nnconv_out_kernel, nk=nk),
        out_shape=jax.ShapeDtypeStruct((Mp, Npad), jnp.float32),
        grid=(Npad // tn, Mp // tm, nk),
        in_specs=[
            pl.BlockSpec((tm, tk), lambda j, i, k: (i, k)),
            pl.BlockSpec((tk, tn), lambda j, i, k: (k, j)),
            pl.BlockSpec((tm, tn), lambda j, i, k: (i, j)),
            pl.BlockSpec((1, tn), lambda j, i, k: (0, j)),
            pl.BlockSpec((1, tn), lambda j, i, k: (0, j)),
            pl.BlockSpec((tm, 1), lambda j, i, k: (i, 0)),
        ],
        out_specs=pl.BlockSpec((tm, tn), lambda j, i, k: (i, j)),
        scratch_shapes=[pltpu.VMEM((tm, tn), jnp.float32)],
        compiler_params=pltpu.CompilerParams(
            dimension_semantics=("parallel", "parallel", "arbitrary")),
    )(xb, wb, ag, sc, sh, mk)
    return out[:M, :N]


# ----------------------------------------------------------------------------
# Plain-JAX glue: gather/scatter, voxel_grid clustering, max_pool, Cartesian.
# ----------------------------------------------------------------------------
def cartesian_attr(pos, src, dst, emask):
    cart = pos[src] - pos[dst]
    cart = jnp.where(emask[:, None], cart, 0.0)
    maxv = jnp.maximum(jnp.max(jnp.abs(cart)), 1e-9)
    attr = cart / (2.0 * maxv) + 0.5
    return jnp.where(emask[:, None], attr, 0.0)


def voxel_max_pool(x, pos, batch, src, dst, node_mask, edge_mask, size):
    # voxel_grid clustering + max_pool(x) / mean-pool(pos) + edge coalescing,
    # with fixed-size padding and validity masks instead of dynamic shapes.
    N = x.shape[0]
    E = src.shape[0]
    BIG = jnp.int32(2 ** 30)

    pmin = jnp.min(jnp.where(node_mask[:, None], pos, jnp.inf), axis=0)
    v = jnp.clip(jnp.floor((pos - pmin) / size).astype(jnp.int32), 0, 10 ** 4)
    span = jnp.max(jnp.where(node_mask[:, None], v, 0), axis=0) + 1
    key = (batch * span[0] + v[:, 0]) * span[1] + v[:, 1]
    key = jnp.where(node_mask, key, BIG)
    _, inv = jnp.unique(key, size=N, fill_value=BIG, return_inverse=True)
    cluster = inv.reshape(-1)

    x_p = jax.ops.segment_max(jnp.where(node_mask[:, None], x, -jnp.inf),
                              cluster, num_segments=N)
    cnt = jax.ops.segment_sum(node_mask.astype(jnp.float32), cluster,
                              num_segments=N)
    new_node_mask = cnt > 0
    x_p = jnp.where(new_node_mask[:, None], x_p, 0.0)

    pos_p = jax.ops.segment_sum(jnp.where(node_mask[:, None], pos, 0.0),
                                cluster, num_segments=N)
    pos_p = pos_p / jnp.maximum(cnt[:, None], 1.0)

    batch_p = jax.ops.segment_max(jnp.where(node_mask, batch, -1),
                                  cluster, num_segments=N)
    batch_p = jnp.where(new_node_mask, batch_p, 0)

    ns, nd = cluster[src], cluster[dst]
    ok = edge_mask & (ns != nd) & node_mask[src] & node_mask[dst]
    sentinel = jnp.int32(N * N)
    ekey = jnp.where(ok, ns * N + nd, sentinel)
    ue = jnp.unique(ekey, size=E, fill_value=sentinel)
    new_edge_mask = ue != sentinel
    new_src = jnp.where(new_edge_mask, ue // N, 0).astype(jnp.int32)
    new_dst = jnp.where(new_edge_mask, ue % N, 0).astype(jnp.int32)
    new_attr = cartesian_attr(pos_p, new_src, new_dst, new_edge_mask)

    return x_p, pos_p, batch_p, new_src, new_dst, new_attr, new_node_mask, new_edge_mask


# ----------------------------------------------------------------------------
# The C block: ECConv(NNConv) + BatchNorm1d + ReLU (BN/ReLU/mask fused into the
# root-transform Pallas epilogue).
# ----------------------------------------------------------------------------
def C_forward(p, x, src, dst, edge_attr, node_mask, edge_mask):
    outdim = p["root_w"].shape[1]

    # edge MLP: Linear(2, indim*outdim) -> ReLU -> Linear(hid, hid), bf16 weights.
    h = dense(edge_attr, p["w1"], p["b1"], relu=True, out_dtype=jnp.bfloat16)
    theta2d = dense(h, p["w2"], p["b2"], relu=False, out_dtype=jnp.bfloat16)

    x_src = x[src]                                   # gather (glue)
    msg = edge_messages(x_src, theta2d, outdim)      # Pallas per-edge contraction
    msg = msg * edge_mask[:, None].astype(msg.dtype)
    aggr = jax.ops.segment_sum(msg, dst, num_segments=x.shape[0])  # scatter-add (glue)

    # eval-mode BatchNorm folded to a per-channel affine; NNConv bias folded in.
    scale = p["gamma"] * jax.lax.rsqrt(p["var"] + 1e-5)
    shift = (p["bias"] - p["mean"]) * scale + p["beta"]
    return nnconv_bn_relu(x, p["root_w"], aggr, scale, shift, node_mask)


# ----------------------------------------------------------------------------
# Parameter init (deterministic, PyTorch-default-style; BN fresh-init eval stats).
# Dense weights stored in bf16 (streamed bf16, accumulated f32 on the MXU).
# ----------------------------------------------------------------------------
def _init_linear(key, fan_in, fan_out):
    k1, k2 = jax.random.split(key)
    bnd = 1.0 / math.sqrt(fan_in)
    w = jax.random.uniform(k1, (fan_in, fan_out), jnp.float32, -bnd, bnd)
    b = jax.random.uniform(k2, (fan_out,), jnp.float32, -bnd, bnd)
    return w, b


def init_C(key, indim, outdim, edge_dim=2):
    hid = indim * outdim
    ks = jax.random.split(key, 3)
    w1, b1 = _init_linear(ks[0], edge_dim, hid)
    w2, b2 = _init_linear(ks[1], hid, hid)
    root_w, bias = _init_linear(ks[2], indim, outdim)
    return dict(
        w1=w1.astype(jnp.bfloat16), b1=b1,
        w2=w2.astype(jnp.bfloat16), b2=b2,
        root_w=root_w.astype(jnp.bfloat16), bias=bias,
        gamma=jnp.ones((outdim,), jnp.float32),
        beta=jnp.zeros((outdim,), jnp.float32),
        mean=jnp.zeros((outdim,), jnp.float32),
        var=jnp.ones((outdim,), jnp.float32),
    )


def init_ECC(key, indim):
    ks = jax.random.split(key, 5)
    fc_w, fc_b = _init_linear(ks[4], 128, 10)
    return dict(
        conv1=init_C(ks[0], indim, 16),
        conv2=init_C(ks[1], 16, 32),
        conv3=init_C(ks[2], 32, 64),
        conv4=init_C(ks[3], 64, 128),
        fc_w=fc_w.astype(jnp.bfloat16), fc_b=fc_b,
    )


# ----------------------------------------------------------------------------
# ECC forward.
# ----------------------------------------------------------------------------
def ecc_forward(params, x, pos, batch, src, dst, edge_attr, node_mask, edge_mask):
    x = C_forward(params["conv1"], x, src, dst, edge_attr, node_mask, edge_mask)
    x, pos, batch, src, dst, edge_attr, node_mask, edge_mask = voxel_max_pool(
        x, pos, batch, src, dst, node_mask, edge_mask, 3.4)

    x = C_forward(params["conv2"], x, src, dst, edge_attr, node_mask, edge_mask)
    x, pos, batch, src, dst, edge_attr, node_mask, edge_mask = voxel_max_pool(
        x, pos, batch, src, dst, node_mask, edge_mask, 6.8)

    x = C_forward(params["conv3"], x, src, dst, edge_attr, node_mask, edge_mask)
    x, pos, batch, src, dst, edge_attr, node_mask, edge_mask = voxel_max_pool(
        x, pos, batch, src, dst, node_mask, edge_mask, 30.0)

    x = C_forward(params["conv4"], x, src, dst, edge_attr, node_mask, edge_mask)

    # TODO(synk): nn.Dropout(p=0.5) implemented as eval-mode identity (inference semantics).
    out = dense(x, params["fc_w"], params["fc_b"], relu=False)
    return out, node_mask


# ----------------------------------------------------------------------------
# Main: small deterministic example graph (2 graphs x 12 nodes, ring edges).
# ----------------------------------------------------------------------------
if __name__ == "__main__":
    key = jax.random.PRNGKey(0)
    k_x, k_pos, k_par = jax.random.split(key, 3)

    INDIM = 4
    N_PER = 12
    N_GRAPHS = 2
    N = N_PER * N_GRAPHS            # 24 nodes (fixed; masks track validity)

    x = jax.random.normal(k_x, (N, INDIM), jnp.float32)
    pos = jax.random.uniform(k_pos, (N, 2), jnp.float32, 0.0, 18.0)
    batch = jnp.repeat(jnp.arange(N_GRAPHS, dtype=jnp.int32), N_PER)

    src_l, dst_l = [], []
    for g in range(N_GRAPHS):
        base = g * N_PER
        for i in range(N_PER):
            a, b = base + i, base + (i + 1) % N_PER
            src_l += [a, b]
            dst_l += [b, a]
    src = jnp.asarray(np.array(src_l, dtype=np.int32))
    dst = jnp.asarray(np.array(dst_l, dtype=np.int32))

    node_mask = jnp.ones((N,), dtype=bool)
    edge_mask = jnp.ones((src.shape[0],), dtype=bool)
    edge_attr = cartesian_attr(pos, src, dst, edge_mask)   # edge_dim = 2

    params = init_ECC(k_par, INDIM)

    out, final_node_mask = ecc_forward(
        params, x, pos, batch, src, dst, edge_attr, node_mask, edge_mask)
    out = jax.block_until_ready(out)

    assert out.shape == (N, 10) and out.dtype == jnp.float32
    print("KERNEL_OK")
</pallas_src>

<mosaic_0001>
module attributes {stable_mosaic.version = 11 : i64} {
  func.func @_dense_kernel(%arg0: i32, %arg1: i32, %arg2: i32, %arg3: memref<48x2xbf16, #tpu.memory_space<vmem>>, %arg4: memref<2x128xbf16, #tpu.memory_space<vmem>>, %arg5: memref<1x128xf32, #tpu.memory_space<vmem>>, %arg6: memref<48x128xbf16, #tpu.memory_space<vmem>>, %arg7: memref<48x128xf32, #tpu.memory_space<vmem>>) attributes {dimension_semantics = [#tpu.dimension_semantics<parallel>, #tpu.dimension_semantics<parallel>, #tpu.dimension_semantics<arbitrary>], iteration_bounds = array<i64: 1, 1, 1>, scalar_prefetch = 0 : i64, scratch_operands = 1 : i64, tpu.core_type = #tpu.core_type<tc>, window_params = [{transform_indices = @transform_0, window_bounds = array<i64: 48, 2>}, {transform_indices = @transform_1, window_bounds = array<i64: 2, 128>}, {transform_indices = @transform_2, window_bounds = array<i64: 1, 128>}, {transform_indices = @transform_3, window_bounds = array<i64: 48, 128>}]} {
    %c0_i32 = arith.constant 0 : i32
    %0 = arith.cmpi eq, %arg2, %c0_i32 : i32
    %1 = arith.extui %0 : i1 to i32
    %c0_i32_0 = arith.constant 0 : i32
    %2 = arith.cmpi ne, %1, %c0_i32_0 : i32
    scf.if %2 {
      %cst_10 = arith.constant 0.000000e+00 : f32
      %12 = vector.broadcast %cst_10 : f32 to vector<48x128xf32>
      %c0_11 = arith.constant 0 : index
      %c0_12 = arith.constant 0 : index
      %13 = vector.load %arg7[%c0_11, %c0_12] : memref<48x128xf32, #tpu.memory_space<vmem>>, vector<48x128xf32>
      tpu.vector_store %arg7[%c0_11, %c0_12], %12 {strides = array<i32>} : memref<48x128xf32, #tpu.memory_space<vmem>>, vector<48x128xf32>,
    } else {
    }
    %c0 = arith.constant 0 : index
    %c0_1 = arith.constant 0 : index
    %3 = vector.load %arg7[%c0, %c0_1] : memref<48x128xf32, #tpu.memory_space<vmem>>, vector<48x128xf32>
    %c0_2 = arith.constant 0 : index
    %c0_3 = arith.constant 0 : index
    %4 = vector.load %arg3[%c0_2, %c0_3] : memref<48x2xbf16, #tpu.memory_space<vmem>>, vector<48x2xbf16>
    %c0_4 = arith.constant 0 : index
    %c0_5 = arith.constant 0 : index
    %5 = vector.load %arg4[%c0_4, %c0_5] : memref<2x128xbf16, #tpu.memory_space<vmem>>, vector<2x128xbf16>
    %cst = arith.constant dense<0.000000e+00> : vector<48x128xf32>
    %6 = tpu.matmul %4, %5, %cst {dimension_numbers = #tpu.dot_dimension_numbers<[1], [0], [0], [1], [0, 0, 1, 1], [], []>} : vector<48x2xbf16>, vector<2x128xbf16>, vector<48x128xf32> -> vector<48x128xf32>
    %7 = arith.addf %3, %6 : vector<48x128xf32>
    %c0_6 = arith.constant 0 : index
    %c0_7 = arith.constant 0 : index
    %8 = vector.load %arg7[%c0_6, %c0_7] : memref<48x128xf32, #tpu.memory_space<vmem>>, vector<48x128xf32>
    tpu.vector_store %arg7[%c0_6, %c0_7], %7 {strides = array<i32>} : memref<48x128xf32, #tpu.memory_space<vmem>>, vector<48x128xf32>,
    %c0_i32_8 = arith.constant 0 : i32
    %9 = arith.cmpi eq, %arg2, %c0_i32_8 : i32
    %10 = arith.extui %9 : i1 to i32
    %c0_i32_9 = arith.constant 0 : i32
    %11 = arith.cmpi ne, %10, %c0_i32_9 : i32
    scf.if %11 {
      %c0_10 = arith.constant 0 : index
      %c0_11 = arith.constant 0 : index
      %12 = vector.load %arg7[%c0_10, %c0_11] : memref<48x128xf32, #tpu.memory_space<vmem>>, vector<48x128xf32>
      %c0_12 = arith.constant 0 : index
      %c0_13 = arith.constant 0 : index
      %13 = vector.load %arg5[%c0_12, %c0_13] : memref<1x128xf32, #tpu.memory_space<vmem>>, vector<1x128xf32>
      %14 = vector.broadcast %13 : vector<1x128xf32> to vector<48x128xf32>
      %15 = arith.addf %12, %14 : vector<48x128xf32>
      %cst_14 = arith.constant 0.000000e+00 : f32
      %16 = vector.broadcast %cst_14 : f32 to vector<48x128xf32>
      %17 = arith.maximumf %15, %16 : vector<48x128xf32>
      %18 = arith.truncf %17 : vector<48x128xf32> to vector<48x128xbf16>
      %c0_15 = arith.constant 0 : index
      %c0_16 = arith.constant 0 : index
      %19 = vector.load %arg6[%c0_15, %c0_16] : memref<48x128xbf16, #tpu.memory_space<vmem>>, vector<48x128xbf16>
      tpu.vector_store %arg6[%c0_15, %c0_16], %18 {strides = array<i32>} : memref<48x128xbf16, #tpu.memory_space<vmem>>, vector<48x128xbf16>,
    } else {
    }
    return
  }
  func.func @transform_0(%arg0: i32, %arg1: i32, %arg2: i32) -> (i32, i32) {
    %c0_i32 = arith.constant 0 : i32
    return %arg1, %arg2 : i32, i32
  }
  func.func @transform_1(%arg0: i32, %arg1: i32, %arg2: i32) -> (i32, i32) {
    %c0_i32 = arith.constant 0 : i32
    return %arg2, %arg0 : i32, i32
  }
  func.func @transform_2(%arg0: i32, %arg1: i32, %arg2: i32) -> (i32, i32) {
    %c0_i32 = arith.constant 0 : i32
    %c0_i32_0 = arith.constant 0 : i32
    return %c0_i32, %arg0 : i32, i32
  }
  func.func @transform_3(%arg0: i32, %arg1: i32, %arg2: i32) -> (i32, i32) {
    %c0_i32 = arith.constant 0 : i32
    return %arg1, %arg0 : i32, i32
  }
}

</mosaic_0001>

<bundles_post_ra>
// kernel: tpu_custom_call.1
= control target key start
LH: loop header
LB: loop body
LE: loop exit
PB: predicated region body
PF: predicated region fallthrough
CT: control target
= control target key end

     0   :  { %vm64_vm0 = vcmask 1040384   ;;  %v299_v1 = vmov 0.0   ;;  %vm300_vm1 = vmmov 0   ;;  %vm54_vm2 = vcmask 15360   ;;  %s351_s0 = inlined_call_operand.vmem [shape: bf16[48,2], index: 0, kind: input, shape index: {}]   ;;  %s352_s1 = inlined_call_operand.vmem [shape: bf16[2,128], index: 1, kind: input, shape index: {}]   ;;  %s353_s2 = inlined_call_operand.vmem [shape: f32[1,128], index: 2, kind: input, shape index: {}]   ;;  %s354_s3 = inlined_call_operand.hbm [shape: bf16[48,128], index: 3, kind: output, shape index: {}]  }
   0x1   :  { %v38_v0 = vld [vmem:[%s352_s1] sm:$0x1]  ;;  %265 = vmatprep.subr.bf16.mxu1 %v299_v1  ;;  %257 = vmatprep.mubr.msk.bf16.mxu1 %vm300_vm1, %v299_v1  ;;  %v272_v3 = vld [vmem:[%s351_s0 + $0x8] sm:$0xff]  }
   0x2   :  { %v66_v2 = vsel %vm64_vm0, %v38_v0, 0  ;;  %251 = vmatprep.subr.bf16.mxu0 %v299_v1  ;;  %v273_v4 = vld [vmem:[%s351_s0] sm:$0xff]   ;;  %253 = vmatprep.mubr.msk.bf16.mxu0 %vm300_vm1, %v299_v1 }
   0x3   :  { %266 = vmatpush3.bf16.msra.mxu1 %v66_v2  ;;  %252 = vmatpush3.bf16.msra.mxu0 %v66_v2 }
   0x4   :  { %8 = vsyncpa [#allocation4], 0  ;;  %v274_v5 = vld [vmem:[%s351_s0 + $0x10] sm:$0xff]   ;;  %v217_v6 = vld [vmem:[%s353_s2] ss:$0 sm:$0xff]  ;;  %s301_s0 = smov [#allocation3]  }
   0x5   :  { %s200_s2 = sshll.u32 %s301_s0, 4  ;;  %s201_s2 = int_to_ptr.vmem [resolvable:$true] %s200_s2 }
   0x6   :  { %258 = vmatmul.mubr.msk.bf16.vlgmr.msra.gmra.mrb[0].mxu1 %vm54_vm2, %v272_v3  ;;  %254 = vmatmul.mubr.msk.bf16.vlgmr.msra.gmra.mrb[0].mxu0 %vm54_vm2, %v273_v4  ;;  %s275_s21 = scalar_lea.vmem %s201_s2, 384  ;;  %p280_p1 = scmp.lt.s32.totalorder %s201_s2, %s201_s2 }
   0x7   :  { %261 = vmatprep.mubr.msk.bf16.mxu1 %vm300_vm1, %v299_v1  ;;  %p276_p0 = scmp.ne.s32.totalorder %s201_s2, %s275_s21  ;;  %p281_p2 = scmp.lt.s32.totalorder %s275_s21, %s275_s21 }
   0x9   :  { %p282_p3 = por %p281_p2, %p280_p1 }
   0xb   :  { %p283_p4 = pnand %p282_p3, %p276_p0 }
   0xe   :  { %262 = vmatmul.mubr.msk.bf16.gmra.mrb[4].mxu1 %vm54_vm2, %v274_v5 }
  0xd9   :  { %v110_v7 = vpop.f32.mrb[0].mxu1  ;;  %v102_v10 = vpop.f32.mrb[0].mxu0 }
  0xda   :  { %v155_v8 = vadd.f32 %v217_v6, %v110_v7  ;;  %v259_v9 = vpop.f32.mrb[1].mxu1  ;;  %v153_v12 = vadd.f32 %v217_v6, %v102_v10  ;;  %v255_v13 = vpop.f32.mrb[1].mxu0 }
  0xdb   :  { %v113_v11 = vpop.f32.mrb[2].mxu1  ;;  %v105_v16 = vpop.f32.mrb[2].mxu0 }
  0xdc   :  { %v156_v14 = vadd.f32 %v217_v6, %v113_v11  ;;  %v260_v15 = vpop.f32.mrb[3].mxu1  ;;  %v159_v17 = vmax.f32 %v153_v12, 0.0  ;;  %v154_v18 = vadd.f32 %v217_v6, %v105_v16  ;;  %v256_v19 = vpop.f32.mrb[3].mxu0  ;;  %v161_v20 = vmax.f32 %v155_v8, 0.0 }
  0xde   :  { %v162_v21 = vmax.f32 %v156_v14, 0.0  ;;  %v160_v22 = vmax.f32 %v154_v18, 0.0 }
  0xe0   :  { %v238_v23 = vpack.c.bf16 %v162_v21, %v161_v20  ;;  %v233_v24 = vpack.c.bf16 %v160_v22, %v159_v17 }
  0xe1   :  { %v118_v25 = vpop.f32.mrb[4].mxu1 }
  0xe2   :  { %245 = vst [vmem:[#allocation3 + $0x8] sm:$0xff] %v238_v23   ;;  %v157_v26 = vadd.f32 %v217_v6, %v118_v25  ;;  %v263_v27 = vpop.f32.mrb[5].mxu1  ;;  %234 = vst [vmem:[#allocation3] sm:$0xff] %v233_v24  }
  0xe3   :  { %v121_v28 = vpop.f32.mrb[6].mxu1 }
  0xe4   :  { %v158_v29 = vadd.f32 %v217_v6, %v121_v28  ;;  %v264_v30 = vpop.f32.mrb[7].mxu1  ;;  %v163_v31 = vmax.f32 %v157_v26, 0.0 }
  0xe6   :  { %v164_v32 = vmax.f32 %v158_v29, 0.0 }
  0xe8   :  { %v243_v33 = vpack.c.bf16 %v164_v32, %v163_v31 }
  0xea   :  { %246 = vst [vmem:[#allocation3 + $0x10] sm:$0xff] %v243_v33  }
  0xeb   :  { %286 = shalt.err (!%p283_p4)
}
  0xec   :  { %s287_s24 = scalar_lea.hbm %s354_s3, 384 }
  0xed   :  { %p288_p5 = scmp.ne.s32.totalorder %s354_s3, %s287_s24  ;;  %p291_p6 = scmp.lt.u32.totalorder %s287_s24, %s354_s3 }
  0xef   :  { %p293_p7 = pnand %p291_p6, %p288_p5 }
  0xf1   :  { %296 = shalt.err (!%p293_p7)
}
  0xf2   :  { %s302_s29 = smov 64   ;;  %s303_s30 = smov 4  }
  0xf3   :  { %206 = dma.vmem_to_hbm [thread:$0]  %s201_s2, 384, %s354_s3, [#allocation4], %s302_s29, %s302_s29, %s303_s30  }
  0xf4   :  { %297 = dma.done.wait [#allocation4], 384  }
  0xf5   :  { %298 = vsyncadd [#allocation4], 4294966912 }
  0xf6   :  { %210 = vsyncpa [#allocation4], 1 }

</bundles_post_ra>
